<compile_context>
chip_gen: v5e
topology: v5e:2x2
jax: 0.10.0
libtpu: 0.0.40
codegen_flags: <defaults>
</compile_context>

<pallas_src>
import jax
import jax.numpy as jnp
from jax import lax
from jax.experimental import pallas as pl
from jax.experimental.pallas import tpu as pltpu


def _round_up(n, m):
    return ((n + m - 1) // m) * m


def _cdiv(a, b):
    return -(-a // b)


# -----------------------------------------------------------------------------
# Kernels
# -----------------------------------------------------------------------------
def _ffpolicy_fwd_kernel(x_ref, w1_ref, w2_ref, w3_ref, b_ref, out_ref, hid_ref):
    """One batch tile: fused actor+critic trunks, packed (value|logits) head."""
    h2w = w2_ref.shape[0]        # round_up(2*H, 128)  fused trunk width
    pout = out_ref.shape[-1]     # padded head width (value | logits | zero pad)
    hp = hid_ref.shape[-1]       # padded hidden width

    x = x_ref[...].astype(w1_ref.dtype)                              # cast in kernel

    # layer 1: both trunks in a single MXU pass, tanh/bias in f32
    h1 = jnp.tanh(
        jnp.dot(x, w1_ref[...], preferred_element_type=jnp.float32)
        + b_ref[0:1, :h2w])
    # layer 2: block-diagonal fused trunks
    h2 = jnp.tanh(
        jnp.dot(h1.astype(w2_ref.dtype), w2_ref[...],
                preferred_element_type=jnp.float32)
        + b_ref[1:2, :h2w])
    # heads: value (critic half) + dist logits (actor half) -> one lane-dense slab
    out = (jnp.dot(h2.astype(w3_ref.dtype), w3_ref[...],
                   preferred_element_type=jnp.float32)
           + b_ref[2:3, :pout])

    out_ref[...] = out.astype(out_ref.dtype)
    hid_ref[...] = h2[:, :hp].astype(hid_ref.dtype)   # actor hidden lives in [:H]


def _ffpolicy_nohid_kernel(x_ref, w1_ref, w2_ref, w3_ref, b_ref, out_ref):
    """forward without the hidden slab (value + logits only)."""
    h2w = w2_ref.shape[0]
    pout = out_ref.shape[-1]

    x = x_ref[...].astype(w1_ref.dtype)
    h1 = jnp.tanh(
        jnp.dot(x, w1_ref[...], preferred_element_type=jnp.float32)
        + b_ref[0:1, :h2w])
    h2 = jnp.tanh(
        jnp.dot(h1.astype(w2_ref.dtype), w2_ref[...],
                preferred_element_type=jnp.float32)
        + b_ref[1:2, :h2w])
    out = (jnp.dot(h2.astype(w3_ref.dtype), w3_ref[...],
                   preferred_element_type=jnp.float32)
           + b_ref[2:3, :pout])
    out_ref[...] = out.astype(out_ref.dtype)


def _make_act_kernel(num_actions):
    """act() hot path: same math, argmax folded in-kernel.

    Output slab: col 0 = value, col 1 = argmax action (as f32), rest zero.
    """
    def kernel(x_ref, w1_ref, w2_ref, w3_ref, b_ref, out_ref):
        h2w = w2_ref.shape[0]
        pout = out_ref.shape[-1]

        x = x_ref[...].astype(w1_ref.dtype)
        h1 = jnp.tanh(
            jnp.dot(x, w1_ref[...], preferred_element_type=jnp.float32)
            + b_ref[0:1, :h2w])
        h2 = jnp.tanh(
            jnp.dot(h1.astype(w2_ref.dtype), w2_ref[...],
                    preferred_element_type=jnp.float32)
            + b_ref[1:2, :h2w])
        out = (jnp.dot(h2.astype(w3_ref.dtype), w3_ref[...],
                       preferred_element_type=jnp.float32)
               + b_ref[2:3, :pout])

        lane = lax.broadcasted_iota(jnp.int32, out.shape, 1)
        valid = (lane >= 1) & (lane < 1 + num_actions)           # logits lanes
        masked = jnp.where(valid, out, -jnp.inf)
        row_max = jnp.max(masked, axis=-1, keepdims=True)
        is_max = (masked == row_max) & valid
        idx = jnp.min(jnp.where(is_max, lane, pout), axis=-1, keepdims=True)
        action_f = (idx - 1).astype(jnp.float32)                 # [TB, 1]
        value = out[:, 0:1]                                      # [TB, 1]

        res = jnp.where(lane == 0, value,
                        jnp.where(lane == 1, action_f, 0.0))
        out_ref[...] = res.astype(out_ref.dtype)
    return kernel


# -----------------------------------------------------------------------------
# Parameter packing (done once, outside the hot path)
# -----------------------------------------------------------------------------
def pack_ffpolicy_params(params, obs_dim, hidden_dim, num_actions,
                         compute_dtype=jnp.bfloat16):
    """Pack 13 small tensors into 3 padded bf16 weight slabs + 1 f32 bias slab.

    Actor occupies lanes [0, H), critic lanes [H, 2H) of the fused trunk
    (width round_up(2H, 128)).  Head slab: col 0 = value, cols 1..A = logits.
    """
    H = hidden_dim
    H2W = _round_up(2 * H, 128)            # fused trunk width
    POUT = _round_up(1 + num_actions, 128) # head slab width
    HPH = min(_round_up(H, 128), H2W)      # hidden output slab width
    BW = max(H2W, POUT)

    # layer 1: [OBS, H2W] = [W1a | W1c | 0...]   (OBS is NOT padded)
    w1 = jnp.zeros((obs_dim, H2W), jnp.float32)
    w1 = w1.at[:, :H].set(params["w1a"])
    w1 = w1.at[:, H:2 * H].set(params["w1c"])
    # layer 2: block-diagonal [H2W, H2W]
    w2 = jnp.zeros((H2W, H2W), jnp.float32)
    w2 = w2.at[:H, :H].set(params["w2a"])
    w2 = w2.at[H:2 * H, H:2 * H].set(params["w2c"])
    # heads: [H2W, POUT]; col 0 = value (critic half), cols 1..A = logits (actor half)
    # TODO(synk): for A >= 128, put value after the logits block to keep slices tile-aligned.
    w3 = jnp.zeros((H2W, POUT), jnp.float32)
    w3 = w3.at[H:2 * H, 0:1].set(params["wv"])
    w3 = w3.at[:H, 1:1 + num_actions].set(params["wd"])
    # biases: one (8, BW) f32 slab; row 0 = layer1, row 1 = layer2, row 2 = heads
    b = jnp.zeros((8, BW), jnp.float32)
    b = b.at[0, :H].set(params["b1a"][0])
    b = b.at[0, H:2 * H].set(params["b1c"][0])
    b = b.at[1, :H].set(params["b2a"][0])
    b = b.at[1, H:2 * H].set(params["b2c"][0])
    b = b.at[2, 0].set(params["bv"][0, 0])
    b = b.at[2, 1:1 + num_actions].set(params["bd"][0])

    return {
        "w1": w1.astype(compute_dtype),
        "w2": w2.astype(compute_dtype),
        "w3": w3.astype(compute_dtype),
        "b": b,                                      # biases stay f32
        "dims": (obs_dim, H, num_actions, H2W, POUT, HPH, BW),
    }


# -----------------------------------------------------------------------------
# Wrappers
# -----------------------------------------------------------------------------
def _specs_and_grid(x, packed, block_b):
    obs_dim = packed["dims"][0]
    B = x.shape[0]
    # >= 2 grid steps when B is large (shards the "parallel" axis across the
    # two v7x TensorCores); tile kept sublane-aligned and capped by block_b.
    TB = min(block_b, max(8, _round_up(_cdiv(B, 2), 8)))
    grid = (_cdiv(B, TB),)

    w1, w2, w3, b = packed["w1"], packed["w2"], packed["w3"], packed["b"]
    in_specs = [
        pl.BlockSpec((TB, obs_dim), lambda i: (i, 0)),   # x: tiled over batch, unpadded OBS
        pl.BlockSpec(w1.shape, lambda i: (0, 0)),        # weights/biases: resident
        pl.BlockSpec(w2.shape, lambda i: (0, 0)),
        pl.BlockSpec(w3.shape, lambda i: (0, 0)),
        pl.BlockSpec(b.shape, lambda i: (0, 0)),
    ]
    cparams = pltpu.CompilerParams(
        dimension_semantics=("parallel",),          # megacore-shard batch on v7x
        vmem_limit_bytes=32 * 1024 * 1024,          # safe on 64 MiB v7x VMEM
    )
    return B, TB, grid, in_specs, cparams, (w1, w2, w3, b)


def ffpolicy_forward(x, packed, *, block_b=2048, with_hidden=True):
    """Returns (value [B,1], logits [B,A], hidden [B,H]) (hidden optional)."""
    obs_dim, hidden_dim, num_actions, H2W, POUT, HPH, BW = packed["dims"]
    B, TB, grid, in_specs, cparams, (w1, w2, w3, b) = _specs_and_grid(x, packed, block_b)

    if with_hidden:
        out, hid_p = pl.pallas_call(
            _ffpolicy_fwd_kernel,
            grid=grid,
            in_specs=in_specs,
            out_specs=(
                pl.BlockSpec((TB, POUT), lambda i: (i, 0)),
                pl.BlockSpec((TB, HPH), lambda i: (i, 0)),
            ),
            out_shape=(
                jax.ShapeDtypeStruct((B, POUT), jnp.float32),
                jax.ShapeDtypeStruct((B, HPH), jnp.bfloat16),   # bf16 hidden slab
            ),
            compiler_params=cparams,
        )(x, w1, w2, w3, b)
        value = out[:, 0:1]
        logits = out[:, 1:1 + num_actions]
        hidden = hid_p[:, :hidden_dim]
        return value, logits, hidden
    else:
        out = pl.pallas_call(
            _ffpolicy_nohid_kernel,
            grid=grid,
            in_specs=in_specs,
            out_specs=pl.BlockSpec((TB, POUT), lambda i: (i, 0)),
            out_shape=jax.ShapeDtypeStruct((B, POUT), jnp.float32),
            compiler_params=cparams,
        )(x, w1, w2, w3, b)
        return out[:, 0:1], out[:, 1:1 + num_actions]


def ffpolicy_act(x, packed, deterministic=True, key=None, *, block_b=2048):
    obs_dim, hidden_dim, num_actions, H2W, POUT, HPH, BW = packed["dims"]
    if deterministic:
        # argmax folded into the kernel: one lane-dense [TB,128] slab out,
        # col 0 = value, col 1 = action.
        B, TB, grid, in_specs, cparams, (w1, w2, w3, b) = _specs_and_grid(x, packed, block_b)
        out = pl.pallas_call(
            _make_act_kernel(num_actions),
            grid=grid,
            in_specs=in_specs,
            out_specs=pl.BlockSpec((TB, POUT), lambda i: (i, 0)),
            out_shape=jax.ShapeDtypeStruct((B, POUT), jnp.float32),
            compiler_params=cparams,
        )(x, w1, w2, w3, b)
        value = out[:, 0:1]
        action = out[:, 1].astype(jnp.int32)
        return value, action
    else:
        # TODO(synk): stochastic dist.sample is thin JAX glue, not in-kernel.
        value, logits = ffpolicy_forward(x, packed, block_b=block_b, with_hidden=False)
        action = jax.random.categorical(key, logits).astype(jnp.int32)
        return value, action


def ffpolicy_evaluate_actions(x, packed, actions, *, block_b=2048):
    value, logits, _hidden = ffpolicy_forward(x, packed, block_b=block_b)
    logp = jax.nn.log_softmax(logits, axis=-1)
    action_log_probs = jnp.take_along_axis(
        logp, actions[:, None].astype(jnp.int32), axis=-1)
    dist_entropy = -(jnp.exp(logp) * logp).sum(-1).mean()
    return value, action_log_probs, dist_entropy


# -----------------------------------------------------------------------------
# Init + pure-JAX reference
# -----------------------------------------------------------------------------
def init_params(key, obs_dim, hidden_dim, num_actions):
    ks = jax.random.split(key, 6)
    s = lambda fan_in: 1.0 / jnp.sqrt(jnp.float32(fan_in))
    return {
        "w1a": jax.random.normal(ks[0], (obs_dim, hidden_dim), jnp.float32) * s(obs_dim),
        "b1a": jnp.zeros((1, hidden_dim), jnp.float32),
        "w2a": jax.random.normal(ks[1], (hidden_dim, hidden_dim), jnp.float32) * s(hidden_dim),
        "b2a": jnp.zeros((1, hidden_dim), jnp.float32),
        "w1c": jax.random.normal(ks[2], (obs_dim, hidden_dim), jnp.float32) * s(obs_dim),
        "b1c": jnp.zeros((1, hidden_dim), jnp.float32),
        "w2c": jax.random.normal(ks[3], (hidden_dim, hidden_dim), jnp.float32) * s(hidden_dim),
        "b2c": jnp.zeros((1, hidden_dim), jnp.float32),
        "wv": jax.random.normal(ks[4], (hidden_dim, 1), jnp.float32) * s(hidden_dim),
        "bv": jnp.zeros((1, 1), jnp.float32),
        "wd": jax.random.normal(ks[5], (hidden_dim, num_actions), jnp.float32) * s(hidden_dim),
        "bd": jnp.zeros((1, num_actions), jnp.float32),
    }


def ref_forward(x, p, emulate_bf16=True):
    c = ((lambda a: a.astype(jnp.bfloat16).astype(jnp.float32))
         if emulate_bf16 else (lambda a: a))
    h1a = jnp.tanh(c(x) @ c(p["w1a"]) + p["b1a"])
    h1c = jnp.tanh(c(x) @ c(p["w1c"]) + p["b1c"])
    h2a = jnp.tanh(c(h1a) @ c(p["w2a"]) + p["b2a"])
    h2c = jnp.tanh(c(h1c) @ c(p["w2c"]) + p["b2c"])
    value = c(h2c) @ c(p["wv"]) + p["bv"]
    logits = c(h2a) @ c(p["wd"]) + p["bd"]
    return value, logits, h2a


if __name__ == "__main__":
    key = jax.random.PRNGKey(0)
    k_x, k_x2, k_s, k_p = jax.random.split(key, 4)

    B, OBS, H, A = 8, 16, 32, 4
    x = jax.random.normal(k_x, (B, OBS), jnp.float32)
    params = init_params(k_p, OBS, H, A)
    packed = pack_ffpolicy_params(params, OBS, H, A)

    # forward + act (deterministic fused-argmax path, and stochastic path)
    value, logits, hidden = ffpolicy_forward(x, packed)
    value_a, action = ffpolicy_act(x, packed, deterministic=True)
    value_s, action_s = ffpolicy_act(x, packed, deterministic=False, key=k_s)
    jax.block_until_ready((value, logits, hidden, value_a, action, value_s, action_s))

    v_ref, l_ref, h_ref = ref_forward(x, params, emulate_bf16=True)
    assert jnp.allclose(value, v_ref, atol=2e-3, rtol=2e-3), "value mismatch"
    assert jnp.allclose(logits, l_ref, atol=2e-3, rtol=2e-3), "logits mismatch"
    # hidden is emitted in bf16 -> looser tolerance (intentional precision tradeoff)
    assert jnp.allclose(hidden.astype(jnp.float32), h_ref, atol=1e-2, rtol=1e-2), \
        "hidden mismatch"
    assert jnp.allclose(value_a, value, atol=1e-4), "act() value mismatch"
    assert bool(jnp.all((action >= 0) & (action < A))), "action out of range"
    chosen = jnp.take_along_axis(logits, action[:, None], axis=-1)[:, 0]
    assert bool(jnp.all(chosen >= logits.max(-1) - 1e-3)), "act() argmax mismatch"
    assert bool(jnp.all((action_s >= 0) & (action_s < A))), "sampled action out of range"

    v_e, lp_e, ent_e = ffpolicy_evaluate_actions(x, packed, action)
    assert v_e.shape == (B, 1) and lp_e.shape == (B, 1) and ent_e.shape == ()

    # second check: larger batch, small tile -> multi-step grid + ragged last tile
    B2 = 600
    x2 = jax.random.normal(k_x2, (B2, OBS), jnp.float32)
    v2, l2, h2 = ffpolicy_forward(x2, packed, block_b=128)
    va2, a2 = ffpolicy_act(x2, packed, deterministic=True, block_b=128)
    jax.block_until_ready((v2, l2, h2, va2, a2))
    v2r, l2r, h2r = ref_forward(x2, params, emulate_bf16=True)
    assert jnp.allclose(v2, v2r, atol=2e-3, rtol=2e-3), "value mismatch (grid)"
    assert jnp.allclose(l2, l2r, atol=2e-3, rtol=2e-3), "logits mismatch (grid)"
    assert jnp.allclose(h2.astype(jnp.float32), h2r, atol=1e-2, rtol=1e-2), \
        "hidden mismatch (grid)"
    assert jnp.allclose(va2, v2, atol=1e-4), "act() value mismatch (grid)"
    assert bool(jnp.all((a2 >= 0) & (a2 < A))), "action out of range (grid)"

    print("KERNEL_OK")
</pallas_src>

<mosaic_0001>
module attributes {stable_mosaic.version = 11 : i64} {
  func.func @_ffpolicy_fwd_kernel(%arg0: i32, %arg1: memref<8x16xf32, #tpu.memory_space<vmem>>, %arg2: memref<16x128xbf16, #tpu.memory_space<vmem>>, %arg3: memref<128x128xbf16, #tpu.memory_space<vmem>>, %arg4: memref<128x128xbf16, #tpu.memory_space<vmem>>, %arg5: memref<8x128xf32, #tpu.memory_space<vmem>>, %arg6: memref<8x128xf32, #tpu.memory_space<vmem>>, %arg7: memref<8x128xbf16, #tpu.memory_space<vmem>>) attributes {dimension_semantics = [#tpu.dimension_semantics<parallel>], iteration_bounds = array<i64: 1>, scalar_prefetch = 0 : i64, scratch_operands = 0 : i64, tpu.core_type = #tpu.core_type<tc>, window_params = [{transform_indices = @transform_0, window_bounds = array<i64: 8, 16>}, {pipeline_mode = #tpu.pipeline_mode<synchronous>, transform_indices = @transform_1, window_bounds = array<i64: 16, 128>}, {pipeline_mode = #tpu.pipeline_mode<synchronous>, transform_indices = @transform_2, window_bounds = array<i64: 128, 128>}, {pipeline_mode = #tpu.pipeline_mode<synchronous>, transform_indices = @transform_3, window_bounds = array<i64: 128, 128>}, {pipeline_mode = #tpu.pipeline_mode<synchronous>, transform_indices = @transform_4, window_bounds = array<i64: 8, 128>}, {transform_indices = @transform_5, window_bounds = array<i64: 8, 128>}, {transform_indices = @transform_6, window_bounds = array<i64: 8, 128>}]} {
    %c0 = arith.constant 0 : index
    %c0_0 = arith.constant 0 : index
    %0 = vector.load %arg1[%c0, %c0_0] : memref<8x16xf32, #tpu.memory_space<vmem>>, vector<8x16xf32>
    %1 = arith.truncf %0 : vector<8x16xf32> to vector<8x16xbf16>
    %c0_1 = arith.constant 0 : index
    %c0_2 = arith.constant 0 : index
    %2 = vector.load %arg2[%c0_1, %c0_2] : memref<16x128xbf16, #tpu.memory_space<vmem>>, vector<16x128xbf16>
    %cst = arith.constant dense<0.000000e+00> : vector<8x128xf32>
    %3 = tpu.matmul %1, %2, %cst {dimension_numbers = #tpu.dot_dimension_numbers<[1], [0], [0], [1], [0, 0, 1, 1], [], []>} : vector<8x16xbf16>, vector<16x128xbf16>, vector<8x128xf32> -> vector<8x128xf32>
    %c0_3 = arith.constant 0 : index
    %c0_4 = arith.constant 0 : index
    %4 = vector.load %arg5[%c0_3, %c0_4] : memref<8x128xf32, #tpu.memory_space<vmem>>, vector<1x128xf32>
    %5 = vector.broadcast %4 : vector<1x128xf32> to vector<8x128xf32>
    %6 = arith.addf %3, %5 : vector<8x128xf32>
    %7 = math.tanh %6 : vector<8x128xf32>
    %8 = arith.truncf %7 : vector<8x128xf32> to vector<8x128xbf16>
    %c0_5 = arith.constant 0 : index
    %c0_6 = arith.constant 0 : index
    %9 = vector.load %arg3[%c0_5, %c0_6] : memref<128x128xbf16, #tpu.memory_space<vmem>>, vector<128x128xbf16>
    %cst_7 = arith.constant dense<0.000000e+00> : vector<8x128xf32>
    %10 = tpu.matmul %8, %9, %cst_7 {dimension_numbers = #tpu.dot_dimension_numbers<[1], [0], [0], [1], [0, 0, 1, 1], [], []>} : vector<8x128xbf16>, vector<128x128xbf16>, vector<8x128xf32> -> vector<8x128xf32>
    %c1 = arith.constant 1 : index
    %c0_8 = arith.constant 0 : index
    %11 = vector.load %arg5[%c1, %c0_8] : memref<8x128xf32, #tpu.memory_space<vmem>>, vector<1x128xf32>
    %12 = vector.broadcast %11 : vector<1x128xf32> to vector<8x128xf32>
    %13 = arith.addf %10, %12 : vector<8x128xf32>
    %14 = math.tanh %13 : vector<8x128xf32>
    %15 = arith.truncf %14 : vector<8x128xf32> to vector<8x128xbf16>
    %c0_9 = arith.constant 0 : index
    %c0_10 = arith.constant 0 : index
    %16 = vector.load %arg4[%c0_9, %c0_10] : memref<128x128xbf16, #tpu.memory_space<vmem>>, vector<128x128xbf16>
    %cst_11 = arith.constant dense<0.000000e+00> : vector<8x128xf32>
    %17 = tpu.matmul %15, %16, %cst_11 {dimension_numbers = #tpu.dot_dimension_numbers<[1], [0], [0], [1], [0, 0, 1, 1], [], []>} : vector<8x128xbf16>, vector<128x128xbf16>, vector<8x128xf32> -> vector<8x128xf32>
    %c2 = arith.constant 2 : index
    %c0_12 = arith.constant 0 : index
    %18 = vector.load %arg5[%c2, %c0_12] : memref<8x128xf32, #tpu.memory_space<vmem>>, vector<1x128xf32>
    %19 = vector.broadcast %18 : vector<1x128xf32> to vector<8x128xf32>
    %20 = arith.addf %17, %19 : vector<8x128xf32>
    %c0_13 = arith.constant 0 : index
    %c0_14 = arith.constant 0 : index
    %21 = vector.load %arg6[%c0_13, %c0_14] : memref<8x128xf32, #tpu.memory_space<vmem>>, vector<8x128xf32>
    tpu.vector_store %arg6[%c0_13, %c0_14], %20 {strides = array<i32>} : memref<8x128xf32, #tpu.memory_space<vmem>>, vector<8x128xf32>,
    %22 = arith.truncf %14 : vector<8x128xf32> to vector<8x128xbf16>
    %c0_15 = arith.constant 0 : index
    %c0_16 = arith.constant 0 : index
    %23 = vector.load %arg7[%c0_15, %c0_16] : memref<8x128xbf16, #tpu.memory_space<vmem>>, vector<8x128xbf16>
    tpu.vector_store %arg7[%c0_15, %c0_16], %22 {strides = array<i32>} : memref<8x128xbf16, #tpu.memory_space<vmem>>, vector<8x128xbf16>,
    return
  }
  func.func @transform_0(%arg0: i32) -> (i32, i32) {
    %c0_i32 = arith.constant 0 : i32
    %c0_i32_0 = arith.constant 0 : i32
    return %arg0, %c0_i32 : i32, i32
  }
  func.func @transform_1(%arg0: i32) -> (i32, i32) {
    %c0_i32 = arith.constant 0 : i32
    %c0_i32_0 = arith.constant 0 : i32
    %c0_i32_1 = arith.constant 0 : i32
    return %c0_i32, %c0_i32_0 : i32, i32
  }
  func.func @transform_2(%arg0: i32) -> (i32, i32) {
    %c0_i32 = arith.constant 0 : i32
    %c0_i32_0 = arith.constant 0 : i32
    %c0_i32_1 = arith.constant 0 : i32
    return %c0_i32, %c0_i32_0 : i32, i32
  }
  func.func @transform_3(%arg0: i32) -> (i32, i32) {
    %c0_i32 = arith.constant 0 : i32
    %c0_i32_0 = arith.constant 0 : i32
    %c0_i32_1 = arith.constant 0 : i32
    return %c0_i32, %c0_i32_0 : i32, i32
  }
  func.func @transform_4(%arg0: i32) -> (i32, i32) {
    %c0_i32 = arith.constant 0 : i32
    %c0_i32_0 = arith.constant 0 : i32
    %c0_i32_1 = arith.constant 0 : i32
    return %c0_i32, %c0_i32_0 : i32, i32
  }
  func.func @transform_5(%arg0: i32) -> (i32, i32) {
    %c0_i32 = arith.constant 0 : i32
    %c0_i32_0 = arith.constant 0 : i32
    return %arg0, %c0_i32 : i32, i32
  }
  func.func @transform_6(%arg0: i32) -> (i32, i32) {
    %c0_i32 = arith.constant 0 : i32
    %c0_i32_0 = arith.constant 0 : i32
    return %arg0, %c0_i32 : i32, i32
  }
}

</mosaic_0001>

<bundles_post_ra>
// kernel: tpu_custom_call.1
= control target key start
LH: loop header
LB: loop body
LE: loop exit
PB: predicated region body
PF: predicated region fallthrough
CT: control target
= control target key end

     0   :  { %12 = vsyncpa [#allocation3], 0  ;;  %s672_s0 = inlined_call_operand.hbm [shape: f32[8,16], index: 0, kind: input, shape index: {}]   ;;  %s673_s1 = inlined_call_operand.hbm [shape: bf16[16,128], index: 1, kind: input, shape index: {}]   ;;  %s674_s2 = inlined_call_operand.hbm [shape: bf16[128,128], index: 2, kind: input, shape index: {}]   ;;  %s675_s3 = inlined_call_operand.hbm [shape: bf16[128,128], index: 3, kind: input, shape index: {}]   ;;  %s676_s4 = inlined_call_operand.hbm [shape: f32[8,128], index: 4, kind: input, shape index: {}]   ;;  %s677_s5 = inlined_call_operand.hbm [shape: f32[8,128], index: 5, kind: output, shape index: {0}]   ;;  %s678_s6 = inlined_call_operand.hbm [shape: bf16[8,128], index: 6, kind: output, shape index: {1}]  }
   0x1   :  { %13 = vsyncpa [#allocation6], 0 }
   0x2   :  { %14 = vsyncpa [#allocation9], 0 }
   0x3   :  { %15 = vsyncpa [#allocation4], 0  ;;  %s32_s23 = sshll.u32 %s673_s1, 4  ;;  %s33_s23 = int_to_ptr.hbm [resolvable:$true] %s32_s23 }
   0x4   :  { %16 = vsyncpa [#allocation13], 0  ;;  %s607_s24 = smov [#allocation5]   ;;  %s58_s28 = sshll.u32 %s675_s3, 4  ;;  %s59_s28 = int_to_ptr.hbm [resolvable:$true] %s58_s28 }
   0x5   :  { %s34_s25 = sshll.u32 %s607_s24, 4  ;;  %s608_s29 = smov 64   ;;  %s35_s25 = int_to_ptr.vmem [resolvable:$true] %s34_s25 }
   0x6   :  { %s609_s30 = smov 4   ;;  %s610_s7 = smov [#allocation8]  }
   0x7   :  { %40 = dma.hbm_to_vmem [thread:$0]  %s33_s23, 128, %s35_s25, [#allocation6], %s608_s29, %s608_s29, %s609_s30  }
   0x8   :  { %s60_s8 = sshll.u32 %s610_s7, 4  ;;  %s22_s11 = sshll.u32 %s672_s0, 4  ;;  %s61_s8 = int_to_ptr.vmem [resolvable:$true] %s60_s8  ;;  %s23_s11 = int_to_ptr.hbm [resolvable:$true] %s22_s11 }
   0x9   :  { %66 = dma.hbm_to_vmem [thread:$0]  %s59_s28, 1024, %s61_s8, [#allocation9], %s608_s29, %s608_s29, %s609_s30  }
   0xa   :  { %s45_s13 = sshll.u32 %s674_s2, 4  ;;  %s611_s14 = smov [#allocation2]   ;;  %s46_s13 = int_to_ptr.hbm [resolvable:$true] %s45_s13 }
   0xb   :  { %s24_s15 = sshll.u32 %s611_s14, 4  ;;  %s612_s3 = smov [#allocation7]   ;;  %s25_s15 = int_to_ptr.vmem [resolvable:$true] %s24_s15 }
   0xc   :  { %27 = dma.hbm_to_vmem [thread:$0]  %s23_s11, 128, %s25_s15, [#allocation3]  }
   0xd   :  { %s47_s16 = sshll.u32 %s612_s3, 4  ;;  %s72_s19 = sshll.u32 %s676_s4, 4  ;;  %s48_s16 = int_to_ptr.vmem [resolvable:$true] %s47_s16  ;;  %s73_s19 = int_to_ptr.hbm [resolvable:$true] %s72_s19 }
   0xe   :  { %53 = dma.hbm_to_vmem [thread:$0]  %s46_s13, 1024, %s48_s16, [#allocation6], %s608_s29, %s608_s29, %s609_s30  }
   0xf   :  { %s613_s0 = smov [#allocation10]  }
  0x10   :  { %s74_s20 = sshll.u32 %s613_s0, 4  ;;  %s75_s20 = int_to_ptr.vmem [resolvable:$true] %s74_s20 }
  0x11   :  { %77 = dma.hbm_to_vmem [thread:$0]  %s73_s19, 128, %s75_s20, [#allocation9]  }
  0x12   :  { %597 = dma.done.wait [#allocation3], 128  }
  0x13   :  { %598 = vsyncadd [#allocation3], 4294967168 }
  0x14   :  { %599 = dma.done.wait [#allocation6], 1152  }
  0x15   :  { %600 = vsyncadd [#allocation6], 4294966144 }
  0x16   :  { %601 = dma.done.wait [#allocation9], 1152  }
  0x17   :  { %602 = vsyncadd [#allocation9], 4294966144  ;;  %v396_v0 = vld [vmem:[#allocation5] sm:$0xff]  ;;  %v99_v1 = vld [vmem:[#allocation2] sm:$0xff]  ;;  %vm111_vm0 = vcmask 130048   ;;  %s614_s2 = smov [#allocation12]  }
  0x18   :  { %v404_v2 = vld [vmem:[#allocation7 + $0x38] sm:$0xff]  ;;  %v100_v3 = vpack.c.bf16 %v99_v1, %v99_v1  ;;  %122 = vmatpush.bf16.msra.mxu0 %v396_v0  ;;  %v403_v4 = vld [vmem:[#allocation7 + $0x30] sm:$0xff]  ;;  %v402_v5 = vld [vmem:[#allocation7 + $0x28] sm:$0xff]  ;;  %s308_s4 = sshll.u32 %s614_s2, 4  ;;  %s310_s23 = sshll.u32 %s678_s6, 4  ;;  %s309_s4 = int_to_ptr.vmem [resolvable:$true] %s308_s4  ;;  %s311_s23 = int_to_ptr.hbm [resolvable:$true] %s310_s23 }
  0x19   :  { %196 = vmatpush.bf16.msra.mxu1 %v404_v2  ;;  %v401_v6 = vld [vmem:[#allocation7 + $0x20] sm:$0xff]  ;;  %v400_v7 = vld [vmem:[#allocation7 + $0x18] sm:$0xff]  ;;  %v399_v8 = vld [vmem:[#allocation7 + $0x10] sm:$0xff]  ;;  %s615_s24 = smov [#allocation11]   ;;  %s299_s28 = sshll.u32 %s677_s5, 4  ;;  %s300_s28 = int_to_ptr.hbm [resolvable:$true] %s299_s28 }
  0x1a   :  { %v398_v9 = vld [vmem:[#allocation7 + $0x8] sm:$0xff]  ;;  %v397_v10 = vld [vmem:[#allocation7] sm:$0xff]  ;;  %v412_v11 = vld [vmem:[#allocation8 + $0x38] sm:$0xff]  ;;  %s297_s25 = sshll.u32 %s615_s24, 4  ;;  %s298_s25 = int_to_ptr.vmem [resolvable:$true] %s297_s25 }
  0x1b   :  { %331 = vmatmul.msk.bf16.vlgmr.msra.gmra.mxu0 %vm111_vm0, %v100_v3  ;;  %277 = vmatpush.bf16.msra.mxu2 %v412_v11  ;;  %v411_v12 = vld [vmem:[#allocation8 + $0x30] sm:$0xff]  ;;  %v410_v13 = vld [vmem:[#allocation8 + $0x28] sm:$0xff]  ;;  %v409_v14 = vld [vmem:[#allocation8 + $0x20] sm:$0xff] }
  0x1c   :  { %v408_v15 = vld [vmem:[#allocation8 + $0x18] sm:$0xff]  ;;  %v422_v16 = vld [vmem:[#allocation10] ss:$0 sm:$0xff]  ;;  %v407_v22 = vld [vmem:[#allocation8 + $0x10] sm:$0xff] }
  0x1d   :  { %197 = vmatpush.bf16.msra.mxu1 %v403_v4  ;;  %v406_v23 = vld [vmem:[#allocation8 + $0x8] sm:$0xff]  ;;  %v405_v24 = vld [vmem:[#allocation8] sm:$0xff] }
  0x1e   :  { %v423_v25 = vld [vmem:[#allocation10 + $0x1] ss:$0 sm:$0xff]  ;;  %v424_v31 = vld [vmem:[#allocation10 + $0x2] ss:$0 sm:$0xff] }
  0x1f   :  { %278 = vmatpush.bf16.msra.mxu2 %v411_v12 }
  0x21   :  { %198 = vmatpush.bf16.msra.mxu1 %v402_v5 }
  0x23   :  { %279 = vmatpush.bf16.msra.mxu2 %v410_v13 }
  0x25   :  { %199 = vmatpush.bf16.msra.mxu1 %v401_v6 }
  0x27   :  { %280 = vmatpush.bf16.msra.mxu2 %v409_v14 }
  0x29   :  { %200 = vmatpush.bf16.msra.mxu1 %v400_v7 }
  0x2b   :  { %281 = vmatpush.bf16.msra.mxu2 %v408_v15 }
  0x2d   :  { %201 = vmatpush.bf16.msra.mxu1 %v399_v8 }
  0x2f   :  { %282 = vmatpush.bf16.msra.mxu2 %v407_v22 }
  0x31   :  { %202 = vmatpush.bf16.msra.mxu1 %v398_v9 }
  0x33   :  { %283 = vmatpush.bf16.msra.mxu2 %v406_v23 }
  0x35   :  { %203 = vmatpush.bf16.msra.mxu1 %v397_v10 }
  0x37   :  { %284 = vmatpush.bf16.msra.mxu2 %v405_v24 }
  0x98   :  { %v124_v17 = vpop.f32.mrf.mxu0 }
  0x99   :  { %v125_v18 = vadd.f32 %v422_v16, %v124_v17 }
  0x9b   :  { %425 = vtanh.f32 %v125_v18 }
  0xa0   :  { %v126_v19 = vpop.f32.mrf.mxu0 }
  0xa1   :  { %v426_v20 = vpop.eup %425 }
  0xa2   :  { %v129_v21 = vpack.c.bf16 %v426_v20, %v426_v20 }
  0xa4   :  { %204 = vmatmul.bf16.vlgmr.msra.gmra.mxu1 %v129_v21 }
 0x121   :  { %v205_v26 = vpop.f32.mrf.mxu1 }
 0x122   :  { %v206_v27 = vadd.f32 %v423_v25, %v205_v26 }
 0x124   :  { %427 = vtanh.f32 %v206_v27 }
 0x129   :  { %v207_v28 = vpop.f32.mrf.mxu1 }
 0x12a   :  { %v428_v29 = vpop.eup %427 }
 0x12b   :  { %v210_v30 = vpack.c.bf16 %v428_v29, %v428_v29 }
 0x12d   :  { %285 = vmatmul.bf16.vlgmr.msra.gmra.mxu2 %v210_v30  ;;  %291 = vst [vmem:[#allocation12] sm:$0xf] %v210_v30 }
 0x12e   :  { %313 = dma.vmem_to_hbm [thread:$0]  %s309_s4, 64, %s311_s23, [#allocation13]  }
 0x1b0   :  { %v286_v32 = vpop.f32.mrf.mxu2 }
 0x1b1   :  { %v287_v33 = vadd.f32 %v424_v31, %v286_v32 }
 0x1b3   :  { %290 = vst [vmem:[#allocation11] sm:$0xff] %v287_v33 }
 0x1b4   :  { %302 = dma.vmem_to_hbm [thread:$0]  %s298_s25, 128, %s300_s28, [#allocation4]  }
 0x1b8   :  { %v288_v34 = vpop.f32.mrf.mxu2 }
 0x1b9   :  { %603 = dma.done.wait [#allocation4], 128  }
 0x1ba   :  { %604 = vsyncadd [#allocation4], 4294967168 }
 0x1bb   :  { %605 = dma.done.wait [#allocation13], 64  }
 0x1bc   :  { %606 = vsyncadd [#allocation13], 4294967232 }
 0x1bd   :  { %322 = vsyncpa [#allocation3], 1 }
 0x1be   :  { %323 = vsyncpa [#allocation6], 1 }
 0x1bf   :  { %324 = vsyncpa [#allocation9], 1 }
 0x1c0   :  { %325 = vsyncpa [#allocation4], 1 }
 0x1c1   :  { %326 = vsyncpa [#allocation13], 1 }

</bundles_post_ra>
